<compile_context>
chip_gen: v7x
topology: tpu7x:2x2x1
jax: 0.10.0
libtpu: 0.0.40
codegen_flags: <defaults>
</compile_context>

<pallas_src>
import math

import jax
import jax.numpy as jnp
from jax.experimental import pallas as pl
from jax.experimental.pallas import tpu as pltpu


# ---------------------------------------------------------------------------
# Kernel: out = x + pe  (native-dtype add; pe row block broadcast over sublanes)
# ---------------------------------------------------------------------------
def _pe_add_kernel(x_ref, pe_ref, o_ref):
    # x_ref / o_ref block: (TB, TF); pe_ref block: (1, TF) — same dtype.
    o_ref[...] = x_ref[...] + pe_ref[...]


# ---------------------------------------------------------------------------
# Helpers
# ---------------------------------------------------------------------------
def _sinusoidal_pe(seq_len: int, hidden_dim: int) -> jax.Array:
    """pe[s, 2k] = sin(s * w_k), pe[s, 2k+1] = cos(s * w_k) — matches the PyTorch buffer."""
    position = jnp.arange(seq_len, dtype=jnp.float32)[:, None]                       # (S, 1)
    div_term = jnp.exp(
        jnp.arange(0, hidden_dim, 2, dtype=jnp.float32) * (-math.log(10000.0) / hidden_dim)
    )                                                                                 # (H/2,)
    angles = position * div_term                                                      # (S, H/2)
    pe = jnp.stack([jnp.sin(angles), jnp.cos(angles)], axis=-1)                       # (S, H/2, 2)
    return pe.reshape(seq_len, hidden_dim)                                            # interleaved


def _round_up(v: int, m: int) -> int:
    return (v + m - 1) // m * m


def _choose_tiles(B: int, F: int, itemsize: int, x_block_bytes: int, sub: int):
    """Pick (tile_b, tile_f) for the flattened (B, F) layout.

    Block shapes obey the TPU rule (sublane dim multiple of `sub` or == B; lane dim
    multiple of 128 or == F), and the *padded* VMEM footprint of one x block stays
    within x_block_bytes.
    """
    pad_b = _round_up(B, sub)
    pad_f = _round_up(F, 128)

    # Whole array fits a single (padded) block.
    if pad_b * pad_f * itemsize <= x_block_bytes:
        return B, F

    # Full-batch blocks with a lane-tiled flattened axis (preferred: keeps grid simple).
    tf = (x_block_bytes // max(pad_b * itemsize, 1)) // 128 * 128
    if tf >= 128:
        return B, min(tf, F)

    # Pathologically large batch: tile the batch (sublane) axis in multiples of `sub` too.
    tile_f = min(F, 512)
    tb = (x_block_bytes // max(_round_up(tile_f, 128) * itemsize, 1)) // sub * sub
    tile_b = max(sub, tb)
    if tile_b > B:
        tile_b = B
    return tile_b, tile_f


def _maybe_split_for_cores(B: int, F: int, tile_b: int, tile_f: int, sub: int):
    """Guarantee >= 2 grid steps so v7x's two TensorCores both get work."""
    if pl.cdiv(B, tile_b) * pl.cdiv(F, tile_f) >= 2:
        return tile_b, tile_f
    if F >= 256:
        return tile_b, _round_up((F + 1) // 2, 128)
    if B >= 2 * sub:
        return _round_up((B + 1) // 2, sub), tile_f
    return tile_b, tile_f  # tiny input: not worth splitting


# ---------------------------------------------------------------------------
# Wrapper
# ---------------------------------------------------------------------------
def positional_encoding(
    x: jax.Array,
    *,
    x_block_bytes: int = 6 * 1024 * 1024,
) -> jax.Array:
    """x: [B, S, H]. Returns x + sinusoidal positional encoding (dropout = identity)."""
    B, S, H = x.shape
    assert H % 2 == 0, "hidden_dim must be even (matches PyTorch module)"

    itemsize = jnp.dtype(x.dtype).itemsize
    sub = max(8, 32 // max(itemsize, 1))  # sublane packing multiple: 8 f32, 16 bf16, 32 int8
    F = S * H

    # Build pe once, cast to compute dtype, flatten to a single lane-dense row.
    pe = _sinusoidal_pe(S, H).astype(x.dtype).reshape(1, F)
    x2 = x.reshape(B, F)

    tile_b, tile_f = _choose_tiles(B, F, itemsize, x_block_bytes, sub)
    tile_b, tile_f = _maybe_split_for_cores(B, F, tile_b, tile_f, sub)

    nb = pl.cdiv(B, tile_b)
    nf = pl.cdiv(F, tile_f)

    # Padded VMEM footprint of one block of x / out / pe (native (sub, 128) tiling),
    # doubled for Pallas' default double-buffering; derive the VMEM limit from it.
    lane_tiles = pl.cdiv(tile_f, 128)
    xb = pl.cdiv(tile_b, sub) * lane_tiles * 4096
    peb = lane_tiles * 4096
    vmem_limit = max(16 * 1024 * 1024, 2 * (2 * xb + peb) + 8 * 1024 * 1024)

    out2 = pl.pallas_call(
        _pe_add_kernel,
        out_shape=jax.ShapeDtypeStruct((B, F), x.dtype),
        grid_spec=pltpu.PrefetchScalarGridSpec(
            num_scalar_prefetch=0,
            grid=(nb, nf),
            in_specs=[
                pl.BlockSpec((tile_b, tile_f), lambda b, f: (b, f)),  # x
                pl.BlockSpec((1, tile_f), lambda b, f: (0, f)),       # pe (broadcast over batch)
            ],
            out_specs=pl.BlockSpec((tile_b, tile_f), lambda b, f: (b, f)),
        ),
        compiler_params=pltpu.CompilerParams(
            dimension_semantics=("parallel", "parallel"),
            vmem_limit_bytes=vmem_limit,
        ),
    )(x2, pe)

    return out2.reshape(B, S, H)


# ---------------------------------------------------------------------------
# Pure-JAX reference mirroring the PyTorch buffer construction
# ---------------------------------------------------------------------------
def _reference(x: jax.Array) -> jax.Array:
    B, S, H = x.shape
    position = jnp.arange(S, dtype=jnp.float32)[:, None]
    div_term = jnp.exp(jnp.arange(0, H, 2, dtype=jnp.float32) * (-math.log(10000.0) / H))
    pe = jnp.zeros((S, H), jnp.float32)
    pe = pe.at[:, 0::2].set(jnp.sin(position * div_term))
    pe = pe.at[:, 1::2].set(jnp.cos(position * div_term))
    return (x.astype(jnp.float32) + pe[None]).astype(x.dtype)


if __name__ == "__main__":
    key = jax.random.PRNGKey(0)

    # Main check: small shapes consistent with the module (batch=2, seq=16, hidden=32).
    B, S, H = 2, 16, 32
    x = jax.random.normal(key, (B, S, H), dtype=jnp.float32)
    out = jax.block_until_ready(positional_encoding(x))
    ref = _reference(x)
    assert out.shape == (B, S, H)
    assert out.dtype == x.dtype
    assert jnp.allclose(out, ref, atol=1e-5, rtol=1e-5)

    # Multi-block streaming path with an edge-masked last lane block (F = 20*48 = 960).
    x2 = jax.random.normal(jax.random.PRNGKey(1), (2, 20, 48), dtype=jnp.float32)
    out2 = jax.block_until_ready(positional_encoding(x2, x_block_bytes=4096))
    assert jnp.allclose(out2, _reference(x2), atol=1e-5, rtol=1e-5)

    # bf16 path: pe cast to the input dtype, native-dtype add (looser tolerance vs f32 ref).
    x3 = jax.random.normal(jax.random.PRNGKey(2), (2, 16, 32), dtype=jnp.float32).astype(jnp.bfloat16)
    out3 = jax.block_until_ready(positional_encoding(x3))
    assert out3.dtype == jnp.bfloat16
    assert jnp.allclose(
        out3.astype(jnp.float32), _reference(x3).astype(jnp.float32), atol=0.05, rtol=0.05
    )

    print("KERNEL_OK")
</pallas_src>

<mosaic_0001>
module attributes {stable_mosaic.version = 11 : i64} {
  func.func @_pe_add_kernel(%arg0: i32, %arg1: i32, %arg2: memref<2x256xf32, #tpu.memory_space<vmem>>, %arg3: memref<1x256xf32, #tpu.memory_space<vmem>>, %arg4: memref<2x256xf32, #tpu.memory_space<vmem>>) attributes {dimension_semantics = [#tpu.dimension_semantics<parallel>, #tpu.dimension_semantics<parallel>], iteration_bounds = array<i64: 1, 2>, scalar_prefetch = 0 : i64, scratch_operands = 0 : i64, tpu.core_type = #tpu.core_type<tc>, window_params = [{transform_indices = @transform_0, window_bounds = array<i64: 2, 256>}, {transform_indices = @transform_1, window_bounds = array<i64: 1, 256>}, {transform_indices = @transform_2, window_bounds = array<i64: 2, 256>}]} {
    %c0 = arith.constant 0 : index
    %c0_0 = arith.constant 0 : index
    %0 = vector.load %arg2[%c0, %c0_0] : memref<2x256xf32, #tpu.memory_space<vmem>>, vector<2x256xf32>
    %c0_1 = arith.constant 0 : index
    %c0_2 = arith.constant 0 : index
    %1 = vector.load %arg3[%c0_1, %c0_2] : memref<1x256xf32, #tpu.memory_space<vmem>>, vector<1x256xf32>
    %2 = vector.broadcast %1 : vector<1x256xf32> to vector<2x256xf32>
    %3 = arith.addf %0, %2 : vector<2x256xf32>
    %c0_3 = arith.constant 0 : index
    %c0_4 = arith.constant 0 : index
    %4 = vector.load %arg4[%c0_3, %c0_4] : memref<2x256xf32, #tpu.memory_space<vmem>>, vector<2x256xf32>
    tpu.vector_store %arg4[%c0_3, %c0_4], %3 {strides = array<i32>} : memref<2x256xf32, #tpu.memory_space<vmem>>, vector<2x256xf32>,
    return
  }
  func.func @transform_0(%arg0: i32, %arg1: i32) -> (i32, i32) {
    %c0_i32 = arith.constant 0 : i32
    return %arg0, %arg1 : i32, i32
  }
  func.func @transform_1(%arg0: i32, %arg1: i32) -> (i32, i32) {
    %c0_i32 = arith.constant 0 : i32
    %c0_i32_0 = arith.constant 0 : i32
    return %c0_i32, %arg1 : i32, i32
  }
  func.func @transform_2(%arg0: i32, %arg1: i32) -> (i32, i32) {
    %c0_i32 = arith.constant 0 : i32
    return %arg0, %arg1 : i32, i32
  }
}

</mosaic_0001>

<bundles_post_ra>
// kernel: tpu_custom_call.1
= control target key start
LH: loop header
LB: loop body
LE: loop exit
PB: predicated region body
PF: predicated region fallthrough
CT: control target
= control target key end

     0   :  { %7 = vsyncpa [#allocation3], 0  ;;  %s837_s0 = inlined_call_operand.hbm [shape: f32[2,512], index: 0, kind: input, shape index: {}]   ;;  %s838_s1 = inlined_call_operand.hbm [shape: f32[1,512], index: 1, kind: input, shape index: {}]   ;;  %s839_s2 = inlined_call_operand.hbm [shape: f32[2,512], index: 2, kind: output, shape index: {}]  }
   0x1   :  { %9 = vsyncpa [#allocation3 + $0x1], 0 }
   0x2   :  { %10 = vsyncpa [#allocation6], 0 }
   0x3   :  { %12 = vsyncpa [#allocation6 + $0x1], 0 }
   0x4   :  { %13 = vsyncpa [#allocation4], 0 }
   0x5   :  { %15 = vsyncpa [#allocation4 + $0x1], 0  ;;  %s622_s9 = smov 0   ;;  %s624_s10 = smov 0  }
   0x6   :  { %s626_s11 = smov 0   ;;  %s628_s12 = smov 0  }
   0x7   :  { %s630_s13 = smov 0   ;;  %s632_s14 = smov 0  }
   0x8 LB: > { %s365_s15 = sadd.s32 4294967295, %s601_s14   ;;  %s366_s16 = sadd.s32 4294967294, %s601_s14   ;;  %s601_s14 = sphi %s632_s14, %s21_s14   ;;  %s597_s13 = sphi %s630_s13, %s859_s13   ;;  %s593_s12 = sphi %s628_s12, %s858_s12   ;;  %s589_s11 = sphi %s626_s11, %s857_s11   ;;  %s585_s10 = sphi %s624_s10, %s856_s10   ;;  %s581_s9 = sphi %s622_s9, %s855_s9  }
   0x9   : > { %s30_s17 = sadd.s32 1, %s597_s13  ;;  %s42_s18 = sadd.s32 1, %s589_s11 }
   0xa   : > { %p31_p0 = scmp.ge.s32.totalorder %s30_s17, 2  ;;  %p49_p1 = scmp.ne.s32.totalorder %s589_s11, %s585_s10 }
   0xb   : > { %p50_p2 = scmp.eq.s32.totalorder %s601_s14, 0  ;;  %p55_p3 = scmp.ne.s32.totalorder %s585_s10, %s581_s9 }
   0xc   : > { %s861_s17 = smov (%p31_p0, %s30_s17), 0  ;;  %p56_p5 = scmp.eq.s32.totalorder %s365_s15, 0 }
   0xd   : > { %p663_p4 = por %p50_p2, %p49_p1  ;;  %s38_s20 = ssub.s32 %s597_s13, %s861_s17 }
   0xe   : > { %p107_p6 = scmp.eq.s32.totalorder %s365_s15, 1  ;;  %p40_p7 = scmp.eq.s32.totalorder %s38_s20, 0 }
   0xf   : > { %p669_p8 = por %p56_p5, %p55_p3  ;;  %p113_p10 = scmp.eq.s32.totalorder %s366_s16, 1 }
  0x10   : > { %p673_p9 = por %p107_p6, %p49_p1  ;;  %p404_p13 = scmp.lt.s32.totalorder %s601_s14, 2 }
  0x11   : > { %s843_s21 = scalar_select %p669_p8, 1, 0 }
  0x12   : > { %s844_s22 = scalar_select %p673_p9, 1, 0 }
  0x13   : > { %s678_s23 = scalar_select %p40_p7, %s589_s11, %s42_s18  }
  0x14   : > { %p680_p11 = por %p113_p10, %p55_p3  ;;  %s687_s25 = sand.u32 1, %s589_s11  }
  0x15   : > { %s369_s26 = sshll.u32 %s687_s25, 2  ;;  %s384_s27 = sshll.u32 %s597_s13, 6 }
  0x16   : > { %s845_s24 = scalar_select %p680_p11, 1, 0 }
  0x17   : > { %s694_s30 = scalar_lea.hbm %s837_s0, %s384_s27  ;;  %s137_s3 = scalar_lea.vmem [#allocation2], %s369_s26 }
  0x18   : > { %s147_s4 = sshll.u32 %s137_s3, 4  ;;  %p700_p0 = pnand %p404_p13, %p663_p4  ;;  %s696_s4 = int_to_ptr.vmem [resolvable:$true] %s147_s4 }
  0x19   : > { %s134_s6 = scalar_lea.sflag [#allocation3], %s687_s25  ;;  %s455_s7 = scalar_lea.hbm %s694_s30, 64 }
  0x1a   : > { %p456_p3 = scmp.ne.s32.totalorder %s694_s30, %s455_s7  ;;  %p457_p5 = pneg %p700_p0 }
  0x1b   : > { %s460_s16 = scalar_lea.hbm %s837_s0, 128  ;;  %p461_p4 = scmp.lt.u32.totalorder %s694_s30, %s837_s0 }
  0x1c   : > { %p458_p6 = pnand %p457_p5, %p456_p3  ;;  %p462_p10 = scmp.lt.u32.totalorder %s460_s16, %s455_s7 }
  0x1d   : > { %p464_p12 = scmp.lt.u32.totalorder %s455_s7, %s694_s30 }
  0x1e   : > { %p459_p7 = pneg %p458_p6  ;;  %p463_p13 = por %p462_p10, %p461_p4 }
  0x20   : > { %p465_p1 = por %p464_p12, %p463_p13 }
  0x22   : > { %p466_p2 = pnand %p465_p1, %p459_p7 }
  0x24   : > { %469 = shalt.err (!%p466_p2)
}
  0x25   : > { %s470_s20 = scalar_lea.vmem %s696_s4, 64  ;;  %s603_s26 = smov [#allocation2]  }
  0x26   : > { %p471_p3 = scmp.ne.s32.totalorder %s696_s4, %s470_s20  ;;  %s475_s27 = sshll.u32 %s603_s26, 4  ;;  %s476_s27 = int_to_ptr.vmem [resolvable:$false] %s475_s27 }
  0x27   : > { %s477_s28 = scalar_lea.vmem %s476_s27, 128  ;;  %p478_p9 = scmp.lt.s32.totalorder %s696_s4, %s476_s27 }
  0x28   : > { %p473_p6 = pnand %p471_p3, %p457_p5  ;;  %p479_p4 = scmp.lt.s32.totalorder %s477_s28, %s470_s20 }
  0x2a   : > { %p474_p11 = pneg %p473_p6  ;;  %p480_p10 = por %p479_p4, %p478_p9 }
  0x2c   : > { %p481_p12 = pnand %p480_p10, %p474_p11 }
  0x2e   : > { %484 = shalt.err (!%p481_p12)
}
  0x2f   : > { %396 = dma.hbm_to_vmem [thread:$0]  (!%p700_p0), %s694_s30, 64, %s696_s4, %s134_s6  }
  0x30   : > { %p847_p1 = scmp.lt.s32.totalorder %s601_s14, 3  ;;  %p848_p2 = scmp.ge.s32.totalorder %s601_s14, 1 }
  0x31   : > { %s372_s3 = sshll.u32 %s687_s25, 1  ;;  %s385_s7 = sshll.u32 %s597_s13, 5 }
  0x32   : > { %p736_p7 = pnand %p848_p2, %p847_p1  ;;  %s745_s16 = scalar_lea.hbm %s838_s1, %s385_s7 }
  0x33   : > { %s158_s18 = scalar_lea.vmem [#allocation5], %s372_s3  ;;  %s155_s30 = scalar_lea.sflag [#allocation6], %s687_s25 }
  0x34   : > { %s849_s29 = scalar_select %p736_p7, 1, 0 }
  0x35   : > { %s166_s19 = sshll.u32 %s158_s18, 4  ;;  %s485_s4 = scalar_lea.hbm %s745_s16, 32  ;;  %s167_s19 = int_to_ptr.vmem [resolvable:$true] %s166_s19 }
  0x36   : > { %p486_p9 = scmp.ne.s32.totalorder %s745_s16, %s485_s4  ;;  %s490_s26 = scalar_lea.hbm %s838_s1, 64 }
  0x37   : > { %p491_p3 = scmp.lt.u32.totalorder %s745_s16, %s838_s1  ;;  %p492_p6 = scmp.lt.u32.totalorder %s490_s26, %s485_s4 }
  0x38   : > { %p488_p11 = pnand %p486_p9, %p457_p5  ;;  %p494_p10 = scmp.lt.u32.totalorder %s485_s4, %s745_s16 }
  0x39   : > { %p493_p4 = por %p492_p6, %p491_p3 }
  0x3a   : > { %p489_p13 = pneg %p488_p11 }
  0x3b   : > { %p495_p12 = por %p494_p10, %p493_p4 }
  0x3d   : > { %p496_p1 = pnand %p495_p12, %p489_p13 }
  0x3f   : > { %499 = shalt.err (!%p496_p1)
}
  0x40   : > { %s500_s25 = scalar_lea.vmem %s167_s19, 32  ;;  %s604_s3 = smov [#allocation5]  }
  0x41   : > { %p501_p2 = scmp.ne.s32.totalorder %s167_s19, %s500_s25  ;;  %s505_s7 = sshll.u32 %s604_s3, 4  ;;  %s506_s7 = int_to_ptr.vmem [resolvable:$false] %s505_s7 }
  0x42   : > { %s507_s8 = scalar_lea.vmem %s506_s7, 64  ;;  %p508_p8 = scmp.lt.s32.totalorder %s167_s19, %s506_s7 }
  0x43   : > { %p503_p9 = pnand %p501_p2, %p457_p5  ;;  %p509_p7 = scmp.lt.s32.totalorder %s507_s8, %s500_s25 }
  0x45   : > { %p504_p11 = pneg %p503_p9  ;;  %p510_p3 = por %p509_p7, %p508_p8 }
  0x47   : > { %p511_p6 = pnand %p510_p3, %p504_p11 }
  0x49   : > { %514 = shalt.err (!%p511_p6)
}
  0x4a   : > { %399 = dma.hbm_to_vmem [thread:$0]  (!%p700_p0), %s745_s16, 32, %s167_s19, %s155_s30  }
  0x4b   : > { %p850_p13 = scmp.ne.s32.totalorder %s849_s29, 0 }
  0x4c   : > { %s770_s15 = sand.u32 (!%p850_p13), 1, %s585_s10   ;;  %p851_p5 = scmp.ne.s32.totalorder (!%p850_p13), %s843_s21, 0 }
  0x4d   : > { %175 = sbr.rel (%p850_p13) target bundleno = 116 (0x74), region = 28  ;;  %s376_s18 = sshll.u32 (!%p850_p13), %s770_s15, 2 }
  0x4e   : > { %s178_s4 = scalar_lea.sflag (!%p850_p13), [#allocation3], %s770_s15  ;;  %s181_s6 = scalar_lea.vmem (!%p850_p13), [#allocation2], %s376_s18 }
  0x54   : > { %568 = dma.done.wait (%p851_p5), %s178_s4, 64  }
  0x55   : > { %570 = vsyncadd (%p851_p5), %s178_s4, 4294967232  ;;  %s377_s5 = sshll.u32 %s770_s15, 1  ;;  %s187_s29 = scalar_lea.sflag [#allocation6], %s770_s15 }
  0x56   : > { %s190_s16 = scalar_lea.vmem [#allocation5], %s377_s5 }
  0x57   : > { %572 = dma.done.wait (%p851_p5), %s187_s29, 32  }
  0x58   : > { %574 = vsyncadd (%p851_p5), %s187_s29, 4294967264  ;;  %v222_v0 = vlaneseq  ;;  %v605_v1 = vmov 1983009808   ;;  %v220_v7 = vld [vmem:[%s190_s16] sm:$0x3]  ;;  %s215_s19 = scalar_lea.vmem [#allocation7], %s376_s18 }
  0x59   : > { %v232_v2 = vunpack.c.l.s4 %v605_v1  ;;  %v219_v12 = vld [vmem:[%s181_s6] sm:$0xf]  ;;  %s258_s30 = sshll.u32 %s215_s19, 4  ;;  %s386_s21 = sshll.u32 %s593_s12, 6  ;;  %s785_s30 = int_to_ptr.vmem [resolvable:$true] %s258_s30 }
  0x5a   : > { %v223_v3 = vshrl.u32 %v222_v0, 7  ;;  %s790_s27 = scalar_lea.hbm %s839_s2, %s386_s21  ;;  %s242_s28 = scalar_lea.sflag [#allocation4], %s770_s15 }
  0x5b   : > { %v233_v6 = vunpack.c.0.s8 %v232_v2  ;;  %s515_s25 = scalar_lea.vmem %s785_s30, 64  ;;  %p852_p0 = scmp.ne.s32.totalorder %s844_s22, 0 }
  0x5c   : > { %v224_v4 = vsub.s32 0, %v223_v3  ;;  %v228_v5 = vsub.s32 1, %v223_v3  ;;  %p516_p8 = scmp.ne.s32.totalorder %s785_s30, %s515_s25  ;;  %s606_s12 = smov [#allocation7]  }
  0x5d   : > { %v236_v10 = vsub.s32 %v233_v6, %v223_v3  ;;  %s519_s3 = sshll.u32 %s606_s12, 4  ;;  %s520_s3 = int_to_ptr.vmem [resolvable:$false] %s519_s3 }
  0x5e   : > { %v225_v8 = vrot.slane %v220_v7, %v224_v4  ;;  %v229_v9 = vrot.slane %v220_v7, %v228_v5  ;;  %p517_p7 = pnand %p516_p8, %p852_p0  ;;  %s521_s7 = scalar_lea.vmem %s520_s3, 128 }
  0x5f   : > { %p522_p10 = scmp.lt.s32.totalorder %s785_s30, %s520_s3  ;;  %p523_p12 = scmp.lt.s32.totalorder %s521_s7, %s515_s25 }
  0x60   : > { %v230_v11 = vcombine.low %v225_v8, %v229_v9  ;;  %p518_p4 = pneg %p517_p7 }
  0x61   : > { %p524_p1 = por %p523_p12, %p522_p10 }
  0x62   : > { %v237_v13 = vrot.slane %v230_v11, %v236_v10 }
  0x63   : > { %p525_p2 = pnand %p524_p1, %p518_p4 }
  0x64   : > { %v239_v14 = vadd.f32 %v237_v13, %v219_v12 }
  0x66   : > { %240 = vst [vmem:[%s215_s19] sm:$0xf] %v239_v14 }
  0x67   : > { %528 = shalt.err (!%p525_p2)
}
  0x68   : > { %s529_s8 = scalar_lea.hbm %s790_s27, 64  ;;  %s533_s4 = scalar_lea.hbm %s839_s2, 128 }
  0x69   : > { %p530_p9 = scmp.ne.s32.totalorder %s790_s27, %s529_s8  ;;  %p534_p6 = scmp.lt.u32.totalorder %s790_s27, %s839_s2 }
  0x6a   : > { %p535_p13 = scmp.lt.u32.totalorder %s533_s4, %s529_s8  ;;  %p537_p8 = scmp.lt.u32.totalorder %s529_s8, %s790_s27 }
  0x6b   : > { %p531_p11 = pnand %p530_p9, %p852_p0 }
  0x6c   : > { %p536_p5 = por %p535_p13, %p534_p6 }
  0x6d   : > { %p532_p3 = pneg %p531_p11 }
  0x6e   : > { %p538_p7 = por %p537_p8, %p536_p5 }
  0x70   : > { %p539_p4 = pnand %p538_p7, %p532_p3 }
  0x72   : > { %542 = shalt.err (!%p539_p4)
}
  0x73   : > { %391 = dma.vmem_to_hbm [thread:$0]  (%p852_p0), %s785_s30, 64, %s790_s27, %s242_s28  }
  0x74 PF: > { %s270_s29 = sand.u32 1, %s581_s9   ;;  %p853_p10 = scmp.ne.s32.totalorder %s845_s24, 0 }
  0x75   : > { %p854_p12 = scmp.ge.s32.totalorder %s601_s14, 2  ;;  %s271_s16 = scalar_lea.sflag [#allocation4], %s270_s29 }
  0x77   : > { %p401_p1 = pnand %p854_p12, %p853_p10 }
  0x79   : > { %576 = dma.done.wait (!%p401_p1), %s271_s16, 64  }
  0x7a   : > { %578 = vsyncadd (!%p401_p1), %s271_s16, 4294967232  ;;  %s21_s14 = sadd.s32 1, %s601_s14   ;;  %s855_s9 = smov %s585_s10 }
  0x7b   : > { %p18_p2 = scmp.ge.s32.totalorder %s21_s14, 4   ;;  %s856_s10 = smov %s589_s11 }
  0x7c   : > { %s857_s11 = smov %s678_s23  ;;  %s858_s12 = smov %s597_s13 }
  0x7d   : > { %s859_s13 = smov %s861_s17  ;;  %20 = sbr.rel (!%p18_p2) target bundleno = 8 (0x8), region = 86 }
  0x84   :  { %276 = vsyncpa [#allocation3], 1 }
  0x85   :  { %278 = vsyncpa [#allocation3 + $0x1], 1 }
  0x86   :  { %279 = vsyncpa [#allocation6], 1 }
  0x87   :  { %281 = vsyncpa [#allocation6 + $0x1], 1 }
  0x88   :  { %282 = vsyncpa [#allocation4], 1 }
  0x89   :  { %284 = vsyncpa [#allocation4 + $0x1], 1 }

</bundles_post_ra>
